<compile_context>
chip_gen: v7x
topology: tpu7x:2x2x1
jax: 0.10.0
libtpu: 0.0.40
codegen_flags: <defaults>
</compile_context>

<pallas_src>
import functools

import jax
import jax.numpy as jnp
from jax.experimental import pallas as pl
from jax.experimental.pallas import tpu as pltpu


def _round_up(x, m):
    return (x + m - 1) // m * m


def _actor_kernel(state_ref, params_ref, out_ref, *, dims, offs):
    """Fused 3-layer MLP on one batch tile.

    `params_ref` is one packed (rows, 128k) f32 VMEM buffer; every weight /
    bias (and the max_action scale) lives in its own sublane-aligned row
    block starting at lane 0, so every slice below is static.
    """
    state_dim, h1, h2, act_dim = dims
    o_w1, o_b1, o_w2, o_b2, o_w3, o_b3, o_s = offs

    w1 = params_ref[o_w1:o_w1 + state_dim, :h1]
    b1 = params_ref[o_b1:o_b1 + 1, :h1]
    w2 = params_ref[o_w2:o_w2 + h1, :h2]
    b2 = params_ref[o_b2:o_b2 + 1, :h2]
    w3 = params_ref[o_w3:o_w3 + h2, :act_dim]
    b3 = params_ref[o_b3:o_b3 + 1, :act_dim]
    scale = params_ref[o_s:o_s + 1, 0:1]          # (1, 1) max_action

    x = state_ref[...]
    a = jnp.dot(x, w1, preferred_element_type=jnp.float32) + b1
    a = jnp.maximum(a, 0.0)
    a = jnp.dot(a, w2, preferred_element_type=jnp.float32) + b2
    a = jnp.maximum(a, 0.0)
    a = jnp.dot(a, w3, preferred_element_type=jnp.float32) + b3
    out_ref[...] = (scale * jnp.tanh(a)).astype(out_ref.dtype)


def pack_params(params, max_action):
    """Pack (in,out)-layout weights + biases + max_action into one 2D f32
    buffer: sublane-aligned (multiple-of-8) row blocks, 128-lane-padded
    columns. Done ONCE at init/load time.

    Returns (packed, dims, offs); dims/offs are static Python ints used to
    slice the buffer inside the kernel.
    """
    w1, b1 = params["w1"], params["b1"]
    w2, b2 = params["w2"], params["b2"]
    w3, b3 = params["w3"], params["b3"]
    state_dim, h1 = w1.shape
    _, h2 = w2.shape
    _, act_dim = w3.shape
    dims = (state_dim, h1, h2, act_dim)

    scale = jnp.full((1, 1), float(max_action), jnp.float32)
    blocks = [w1, b1[None, :], w2, b2[None, :], w3, b3[None, :], scale]
    cols = _round_up(max(b.shape[1] for b in blocks), 128)   # lane-dense DMA

    offs = []
    row = 0
    for blk in blocks:
        offs.append(row)
        row += _round_up(blk.shape[0], 8)          # sublane-aligned starts
    total_rows = _round_up(row, 8)

    packed = jnp.zeros((total_rows, cols), jnp.float32)
    for off, blk in zip(offs, blocks):
        packed = packed.at[off:off + blk.shape[0], :blk.shape[1]].set(
            blk.astype(jnp.float32))
    return packed, dims, tuple(offs)


@functools.partial(jax.jit, static_argnames=("dims", "offs", "block_b"))
def actor_forward_packed(state, packed, *, dims, offs, block_b=512):
    """Jitted forward: pad batch to a tile multiple, run the fused kernel on
    a 1-D (parallel) batch grid, slice back. Single dispatch per call."""
    state_dim, h1, h2, act_dim = dims
    B = state.shape[0]

    # Batch tile: multiple of 8 (f32 sublane), capped at block_b (sized for
    # v7x's 64 MiB VMEM; at these feature widths bigger tiles buy nothing).
    TB = min(block_b, _round_up(max(B, 1), 8))
    B_pad = _round_up(max(B, 1), TB)
    if B_pad != B:
        state = jnp.pad(state, ((0, B_pad - B), (0, 0)))

    rows, cols = packed.shape
    grid = (B_pad // TB,)

    cost = pl.CostEstimate(
        flops=2 * B_pad * (state_dim * h1 + h1 * h2 + h2 * act_dim),
        transcendentals=B_pad * act_dim,
        bytes_accessed=4 * (B_pad * state_dim + rows * cols + B_pad * act_dim),
    )

    kernel = functools.partial(_actor_kernel, dims=dims, offs=offs)

    out = pl.pallas_call(
        kernel,
        out_shape=jax.ShapeDtypeStruct((B_pad, act_dim), jnp.float32),
        grid=grid,
        in_specs=[
            pl.BlockSpec((TB, state_dim), lambda i: (i, 0)),
            pl.BlockSpec((rows, cols), lambda i: (0, 0)),   # VMEM-resident
        ],
        out_specs=pl.BlockSpec((TB, act_dim), lambda i: (i, 0)),
        compiler_params=pltpu.CompilerParams(
            dimension_semantics=("parallel",)),
        cost_estimate=cost,
    )(state, packed)
    return out[:B] if B_pad != B else out


def make_actor(params, max_action, block_b=512):
    """Pack params ONCE and return a forward closure. Use this (or
    actor_forward_packed directly) in hot loops — never re-pack per call."""
    packed, dims, offs = pack_params(params, max_action)

    def forward(state):
        return actor_forward_packed(state, packed, dims=dims, offs=offs,
                                    block_b=block_b)

    return forward


def actor_ref(state, params, max_action):
    """Pure-JAX reference (params already in (in, out) layout)."""
    a = jnp.maximum(state @ params["w1"] + params["b1"], 0.0)
    a = jnp.maximum(a @ params["w2"] + params["b2"], 0.0)
    return max_action * jnp.tanh(a @ params["w3"] + params["b3"])


def init_params(key, state_dim, action_dim, hidden_sizes):
    """Deterministic init mimicking nn.Linear default U(-1/sqrt(fan_in), ...),
    stored directly in (in, out) layout so no transpose is ever needed."""
    dims = [state_dim] + list(hidden_sizes) + [action_dim]
    params = {}
    for i, name in enumerate(["1", "2", "3"]):
        fan_in, fan_out = dims[i], dims[i + 1]
        key, kw, kb = jax.random.split(key, 3)
        bound = 1.0 / jnp.sqrt(float(fan_in))
        params["w" + name] = jax.random.uniform(
            kw, (fan_in, fan_out), jnp.float32, minval=-bound, maxval=bound)
        params["b" + name] = jax.random.uniform(
            kb, (fan_out,), jnp.float32, minval=-bound, maxval=bound)
    return params


if __name__ == "__main__":
    batch = 2
    state_dim = 16
    action_dim = 8
    hidden_sizes = [32, 32]
    max_action = 2.0

    key = jax.random.PRNGKey(0)
    key, k_state = jax.random.split(key)
    state = jax.random.normal(k_state, (batch, state_dim), jnp.float32)
    params = init_params(key, state_dim, action_dim, hidden_sizes)

    # Pack weights once (init/load time); forward is a single jitted dispatch.
    actor = make_actor(params, max_action)

    out = jax.block_until_ready(actor(state))

    expected = actor_ref(state, params, max_action)
    assert out.shape == (batch, action_dim)
    assert jnp.allclose(out, expected, atol=1e-5, rtol=1e-5), (
        f"max abs err = {jnp.max(jnp.abs(out - expected))}")

    print("KERNEL_OK")
</pallas_src>

<mosaic_0001>
module attributes {stable_mosaic.version = 11 : i64} {
  func.func @_actor_kernel(%arg0: i32, %arg1: memref<8x16xf32, #tpu.memory_space<vmem>>, %arg2: memref<112x128xf32, #tpu.memory_space<vmem>>, %arg3: memref<8x8xf32, #tpu.memory_space<vmem>>) attributes {dimension_semantics = [#tpu.dimension_semantics<parallel>], iteration_bounds = array<i64: 1>, scalar_prefetch = 0 : i64, scratch_operands = 0 : i64, tpu.core_type = #tpu.core_type<tc>, window_params = [{transform_indices = @transform_0, window_bounds = array<i64: 8, 16>}, {pipeline_mode = #tpu.pipeline_mode<synchronous>, transform_indices = @transform_1, window_bounds = array<i64: 112, 128>}, {transform_indices = @transform_2, window_bounds = array<i64: 8, 8>}]} {
    %c0 = arith.constant 0 : index
    %c0_0 = arith.constant 0 : index
    %0 = vector.load %arg2[%c0, %c0_0] : memref<112x128xf32, #tpu.memory_space<vmem>>, vector<16x32xf32>
    %c16 = arith.constant 16 : index
    %c0_1 = arith.constant 0 : index
    %1 = vector.load %arg2[%c16, %c0_1] : memref<112x128xf32, #tpu.memory_space<vmem>>, vector<1x32xf32>
    %c24 = arith.constant 24 : index
    %c0_2 = arith.constant 0 : index
    %2 = vector.load %arg2[%c24, %c0_2] : memref<112x128xf32, #tpu.memory_space<vmem>>, vector<32x32xf32>
    %c56 = arith.constant 56 : index
    %c0_3 = arith.constant 0 : index
    %3 = vector.load %arg2[%c56, %c0_3] : memref<112x128xf32, #tpu.memory_space<vmem>>, vector<1x32xf32>
    %c64 = arith.constant 64 : index
    %c0_4 = arith.constant 0 : index
    %4 = vector.load %arg2[%c64, %c0_4] : memref<112x128xf32, #tpu.memory_space<vmem>>, vector<32x8xf32>
    %c96 = arith.constant 96 : index
    %c0_5 = arith.constant 0 : index
    %5 = vector.load %arg2[%c96, %c0_5] : memref<112x128xf32, #tpu.memory_space<vmem>>, vector<1x8xf32>
    %c104 = arith.constant 104 : index
    %c0_6 = arith.constant 0 : index
    %6 = vector.load %arg2[%c104, %c0_6] : memref<112x128xf32, #tpu.memory_space<vmem>>, vector<1x1xf32>
    %c0_7 = arith.constant 0 : index
    %c0_8 = arith.constant 0 : index
    %7 = vector.load %arg1[%c0_7, %c0_8] : memref<8x16xf32, #tpu.memory_space<vmem>>, vector<8x16xf32>
    %cst = arith.constant dense<0.000000e+00> : vector<8x32xf32>
    %8 = tpu.matmul %7, %0, %cst {dimension_numbers = #tpu.dot_dimension_numbers<[1], [0], [0], [1], [0, 0, 1, 1], [], []>} : vector<8x16xf32>, vector<16x32xf32>, vector<8x32xf32> -> vector<8x32xf32>
    %9 = vector.broadcast %1 : vector<1x32xf32> to vector<8x32xf32>
    %10 = arith.addf %8, %9 : vector<8x32xf32>
    %cst_9 = arith.constant 0.000000e+00 : f32
    %11 = vector.broadcast %cst_9 : f32 to vector<8x32xf32>
    %12 = arith.maximumf %10, %11 : vector<8x32xf32>
    %cst_10 = arith.constant dense<0.000000e+00> : vector<8x32xf32>
    %13 = tpu.matmul %12, %2, %cst_10 {dimension_numbers = #tpu.dot_dimension_numbers<[1], [0], [0], [1], [0, 0, 1, 1], [], []>} : vector<8x32xf32>, vector<32x32xf32>, vector<8x32xf32> -> vector<8x32xf32>
    %14 = vector.broadcast %3 : vector<1x32xf32> to vector<8x32xf32>
    %15 = arith.addf %13, %14 : vector<8x32xf32>
    %cst_11 = arith.constant 0.000000e+00 : f32
    %16 = vector.broadcast %cst_11 : f32 to vector<8x32xf32>
    %17 = arith.maximumf %15, %16 : vector<8x32xf32>
    %cst_12 = arith.constant dense<0.000000e+00> : vector<8x8xf32>
    %18 = tpu.matmul %17, %4, %cst_12 {dimension_numbers = #tpu.dot_dimension_numbers<[1], [0], [0], [1], [0, 0, 1, 1], [], []>} : vector<8x32xf32>, vector<32x8xf32>, vector<8x8xf32> -> vector<8x8xf32>
    %19 = vector.broadcast %5 : vector<1x8xf32> to vector<8x8xf32>
    %20 = arith.addf %18, %19 : vector<8x8xf32>
    %21 = math.tanh %20 : vector<8x8xf32>
    %22 = vector.broadcast %6 : vector<1x1xf32> to vector<8x8xf32>
    %23 = arith.mulf %22, %21 : vector<8x8xf32>
    %c0_13 = arith.constant 0 : index
    %c0_14 = arith.constant 0 : index
    %24 = vector.load %arg3[%c0_13, %c0_14] : memref<8x8xf32, #tpu.memory_space<vmem>>, vector<8x8xf32>
    tpu.vector_store %arg3[%c0_13, %c0_14], %23 {strides = array<i32>} : memref<8x8xf32, #tpu.memory_space<vmem>>, vector<8x8xf32>,
    return
  }
  func.func @transform_0(%arg0: i32) -> (i32, i32) {
    %c0_i32 = arith.constant 0 : i32
    %c0_i32_0 = arith.constant 0 : i32
    return %arg0, %c0_i32 : i32, i32
  }
  func.func @transform_1(%arg0: i32) -> (i32, i32) {
    %c0_i32 = arith.constant 0 : i32
    %c0_i32_0 = arith.constant 0 : i32
    %c0_i32_1 = arith.constant 0 : i32
    return %c0_i32, %c0_i32_0 : i32, i32
  }
  func.func @transform_2(%arg0: i32) -> (i32, i32) {
    %c0_i32 = arith.constant 0 : i32
    %c0_i32_0 = arith.constant 0 : i32
    return %arg0, %c0_i32 : i32, i32
  }
}

</mosaic_0001>

<bundles_post_ra>
// kernel: actor_forward_packed.1
= control target key start
LH: loop header
LB: loop body
LE: loop exit
PB: predicated region body
PF: predicated region fallthrough
CT: control target
= control target key end

     0   :  { %7 = vsyncpa [#allocation3], 0  ;;  %s385_s9 = smov [#allocation2]   ;;  %s427_s0 = inlined_call_operand.vmem [shape: f32[8,16], index: 0, kind: input, shape index: {}]   ;;  %s428_s1 = inlined_call_operand.hbm [shape: f32[112,128], index: 1, kind: input, shape index: {}]   ;;  %s429_s2 = inlined_call_operand.vmem [shape: f32[8,8], index: 2, kind: output, shape index: {}]  }
   0x1   :  { %s15_s10 = sshll.u32 %s385_s9, 4  ;;  %s361_s13 = scalar_lea.hbm %s428_s1, 1792  ;;  %s16_s10 = int_to_ptr.vmem [resolvable:$true] %s15_s10 }
   0x2   :  { %p362_p0 = scmp.ne.s32.totalorder %s428_s1, %s361_s13  ;;  %p365_p1 = scmp.lt.u32.totalorder %s361_s13, %s428_s1 }
   0x4   :  { %p367_p2 = pnand %p365_p1, %p362_p0 }
   0x6   :  { %370 = shalt.err (!%p367_p2)
}
   0x7   :  { %s371_s18 = scalar_lea.vmem %s16_s10, 1792  ;;  %p376_p4 = scmp.lt.s32.totalorder %s16_s10, %s16_s10 }
   0x8   :  { %p372_p3 = scmp.ne.s32.totalorder %s16_s10, %s371_s18  ;;  %p377_p5 = scmp.lt.s32.totalorder %s371_s18, %s371_s18 }
   0xa   :  { %p378_p6 = por %p377_p5, %p376_p4 }
   0xc   :  { %p379_p7 = pnand %p378_p6, %p372_p3 }
   0xe   :  { %382 = shalt.err (!%p379_p7)
}
   0xf   :  { %s386_s19 = smov 128   ;;  %s387_s20 = smov 8  }
  0x10   :  { %21 = dma.hbm_to_vmem [thread:$0]  %s428_s1, 1792, %s16_s10, [#allocation3], %s386_s19, %s386_s19, %s387_s20  }
  0x11   :  { %383 = dma.done.wait [#allocation3], 1792  }
  0x12   :  { %384 = vsyncadd [#allocation3], 4294965504  ;;  %v388_v0 = vmov 0.0|0.0   ;;  %vm389_vm0 = vmmov 0   ;;  %v390_v1 = vmov 0.0   ;;  %v25_v2 = vld [vmem:[#allocation2] sm:$0xff] }
  0x13   :  { %336 = vmatprep.subr.bf16.mxu0 %v388_v0  ;;  %311 = vmatprep.mubr.msk.f32.mxu0 %vm389_vm0, %v390_v1  ;;  %v26_v3 = vld [vmem:[#allocation2 + $0x8] sm:$0xff]  ;;  %v28_v5 = vld [vmem:[#allocation2 + $0x18] sm:$0xff]  ;;  %v29_v6 = vld [vmem:[#allocation2 + $0x20] sm:$0xff]  ;;  %vm44_vm1 = vcmask 130048   ;;  %vm123_vm2 = vcmask 261120   ;;  %vm281_vm3 = vcmask 64512  }
  0x14   :  { %339 = vmatprep.subr.bf16.mxu1 %v388_v0  ;;  %322 = vmatprep.mubr.msk.f32.mxu1 %vm389_vm0, %v390_v1  ;;  %v337_v4 = vpack.c.bf16 %v26_v3, %v25_v2  ;;  %v340_v7 = vpack.c.bf16 %v29_v6, %v28_v5  ;;  %v39_v8 = vld [vmem:[%s427_s0] sm:$0xff]  ;;  %v30_v9 = vld [vmem:[#allocation2 + $0x28] sm:$0xff]  ;;  %v31_v10 = vld [vmem:[#allocation2 + $0x30] sm:$0xff] }
  0x15   :  { %v343_v11 = vpack.c.bf16 %v31_v10, %v30_v9  ;;  %v33_v12 = vld [vmem:[#allocation2 + $0x40] sm:$0xff]  ;;  %v34_v13 = vld [vmem:[#allocation2 + $0x48] sm:$0xff]  ;;  %v288_v15 = vld [vmem:[#allocation2 + $0x10] ss:$0 sm:$0xff] }
  0x16   :  { %338 = vmatpush3.bf16.msra.mxu0 %v337_v4  ;;  %341 = vmatpush3.bf16.msra.mxu1 %v340_v7  ;;  %v346_v14 = vpack.c.bf16 %v34_v13, %v33_v12  ;;  %v35_v20 = vld [vmem:[#allocation2 + $0x50] sm:$0xff]  ;;  %v36_v21 = vld [vmem:[#allocation2 + $0x58] sm:$0xff]  ;;  %v38_v23 = vld [vmem:[#allocation2 + $0x68] sm:$0x1] }
  0x17   :  { %345 = vmatprep.subr.bf16.mxu0 %v388_v0  ;;  %342 = vmatprep.subr.bf16.mxu1 %v388_v0  ;;  %v349_v22 = vpack.c.bf16 %v36_v21, %v35_v20  ;;  %351 = vpush %v38_v23  ;;  %v290_v24 = vld [vmem:[#allocation2 + $0x38] ss:$0 sm:$0xff]  ;;  %v292_v29 = vld [vmem:[#allocation2 + $0x60] ss:$0 sm:$0xff] }
  0x19   :  { %312 = vmatmul.mubr.msk.f32.vlgmr.msra.gmra.mrb[0].mxu0 %vm44_vm1, %v39_v8 }
  0x1a   :  { %333 = vmatprep.mubr.msk.f32.mxu0 %vm389_vm0, %v390_v1  ;;  %344 = vmatpush3.bf16.msra.mxu1 %v343_v11 }
  0x1b   :  { %347 = vmatpush3.bf16.msra.mxu0 %v346_v14 }
  0x1c   :  { %348 = vmatprep.subr.bf16.mxu0 %v388_v0 }
  0x1f   :  { %350 = vmatpush3.bf16.msra.mxu0 %v349_v22 }
  0x48   :  { %s352_s0 = spop %351 }
  0x49   :  { %v278_v33 = vstv %s352_s0 }
  0xec   :  { %v114_v16 = vpop.f32.mrb[0].mxu0 }
  0xed   :  { %v115_v17 = vadd.f32 %v288_v15, %v114_v16  ;;  %v313_v18 = vpop.f32.mrb[1].mxu0 }
  0xef   :  { %v118_v19 = vmax.f32 %v115_v17, 0.0 }
  0xf1   :  { %323 = vmatmul.mubr.msk.f32.vlgmr.msra.gmra.mrb[0].mxu1 %vm123_vm2, %v118_v19 }
 0x1c4   :  { %v193_v25 = vpop.f32.mrb[0].mxu1 }
 0x1c5   :  { %v194_v26 = vadd.f32 %v290_v24, %v193_v25  ;;  %v324_v27 = vpop.f32.mrb[1].mxu1 }
 0x1c7   :  { %v197_v28 = vmax.f32 %v194_v26, 0.0 }
 0x1c9   :  { %334 = vmatmul.mubr.msk.f32.vlgmr.msra.gmra.mrb[2].mxu0 %vm123_vm2, %v197_v28 }
 0x29c   :  { %v271_v30 = vpop.f32.mrb[2].mxu0 }
 0x29d   :  { %v272_v31 = vadd.f32 %v292_v29, %v271_v30  ;;  %v335_v32 = vpop.f32.mrb[3].mxu0 }
 0x29f   :  { %359 = vtanh.f32 %v272_v31 }
 0x2a9   :  { %v360_v34 = vpop.eup %359 }
 0x2aa   :  { %v280_v35 = vmul.f32 %v360_v34, %v278_v33 }
 0x2ac   :  { %282 = vst.msk [vmem:[%s429_s2] sm:$0xff] %vm281_vm3, %v280_v35 }
 0x2ad   :  { %287 = vsyncpa [#allocation3], 1 }

</bundles_post_ra>
